<compile_context>
chip_gen: v7x
topology: tpu7x:2x2x1
jax: 0.10.0
libtpu: 0.0.40
codegen_flags: <defaults>
</compile_context>

<pallas_src>
import functools

import jax
import jax.numpy as jnp
from jax.experimental import pallas as pl
from jax.experimental.pallas import tpu as pltpu


# ---------------------------------------------------------------------------
# Kernel
# ---------------------------------------------------------------------------
def encoder_kernel(x_ref, w_ref, b_ref, out_ref):
    # x_ref:   (tm, C*F)      float32 input tile (natural layout, free reshape of (B,C,F))
    # w_ref:   (C*F, CK_pad)  bf16 block-diagonal fused weight, columns in (k, c) order + pad
    # b_ref:   (1, CK_pad)    bf16 fused bias
    # out_ref: (tm, CK_pad)   float32 lane-dense output slab
    x = x_ref[...].astype(jnp.bfloat16)
    acc = jnp.dot(x, w_ref[...], preferred_element_type=jnp.float32)
    out_ref[...] = (acc + b_ref[...].astype(jnp.float32)).astype(out_ref.dtype)


# ---------------------------------------------------------------------------
# Offline weight preparation
# ---------------------------------------------------------------------------
def prepare_fused_params(w1, b1, w2, b2, *, lane_multiple=128):
    """Fuse per-channel Linear with the shared Linear into one block-diagonal matmul.

    Column order is (k-major, c-minor):
        W_blk[c*F:(c+1)*F, k*C + c] = (W1[c] @ W2)[:, k]
        b_blk[k*C + c]              = (b1[c] @ W2 + b2)[k]
    so the kernel output reshapes directly to (B, K, C) without a transpose.
    Columns are zero-padded up to a multiple of `lane_multiple` for unmasked stores.
    Weights are returned in bfloat16 (accumulation stays f32 in the kernel).
    """
    C, F, _H = w1.shape
    K = w2.shape[-1]
    CK = C * K
    CK_pad = ((CK + lane_multiple - 1) // lane_multiple) * lane_multiple

    w_fused = jnp.einsum("cfh,hk->cfk", w1, w2)               # (C, F, K)
    b_fused = jnp.einsum("ch,hk->ck", b1, w2) + b2[None, :]   # (C, K)

    w_blk = jnp.zeros((C * F, CK_pad), dtype=jnp.float32)
    for c in range(C):
        # channel c owns output columns k*C + c, k = 0..K-1  (strided slice c::C)
        w_blk = w_blk.at[c * F:(c + 1) * F, c:CK:C].set(w_fused[c])

    b_blk = jnp.zeros((1, CK_pad), dtype=jnp.float32)
    b_blk = b_blk.at[0, :CK].set(b_fused.T.reshape(CK))       # index k*C + c

    return w_blk.astype(jnp.bfloat16), b_blk.astype(jnp.bfloat16)


# ---------------------------------------------------------------------------
# Forward wrapper
# ---------------------------------------------------------------------------
@functools.partial(jax.jit, static_argnames=("n_channels", "n_bottleneck", "block_b"))
def encoder_forward(x, w_blk, b_blk, *, n_channels, n_bottleneck, block_b=1024):
    """x: (B, C, F) float32. Returns (B, K, C) float32, matching the PyTorch Encoder."""
    B, C, F = x.shape
    assert C == n_channels
    K = n_bottleneck
    CK = C * K
    CK_pad = w_blk.shape[-1]

    x_flat = x.reshape(B, C * F)  # free view: natural (B, C, F) layout, no HBM transpose

    cost = pl.CostEstimate(
        flops=2 * B * (C * F) * CK_pad,
        bytes_accessed=(x_flat.size * x_flat.dtype.itemsize
                        + w_blk.size * w_blk.dtype.itemsize
                        + b_blk.size * b_blk.dtype.itemsize
                        + B * CK_pad * x.dtype.itemsize),
        transcendentals=0,
    )

    if B <= block_b:
        # Small batch: single invocation, no grid, everything VMEM-resident.
        out_flat = pl.pallas_call(
            encoder_kernel,
            out_shape=jax.ShapeDtypeStruct((B, CK_pad), x.dtype),
            in_specs=[
                pl.BlockSpec(memory_space=pltpu.MemorySpace.VMEM),
                pl.BlockSpec(memory_space=pltpu.MemorySpace.VMEM),
                pl.BlockSpec(memory_space=pltpu.MemorySpace.VMEM),
            ],
            out_specs=pl.BlockSpec(memory_space=pltpu.MemorySpace.VMEM),
            cost_estimate=cost,
        )(x_flat, w_blk, b_blk)
    else:
        # Large batch: tile B, keep the (tiny) fused weight resident across the grid.
        tm = block_b
        out_flat = pl.pallas_call(
            encoder_kernel,
            out_shape=jax.ShapeDtypeStruct((B, CK_pad), x.dtype),
            grid=(pl.cdiv(B, tm),),
            in_specs=[
                pl.BlockSpec((tm, C * F), lambda i: (i, 0)),      # streamed input tiles
                pl.BlockSpec((C * F, CK_pad), lambda i: (0, 0)),  # resident fused weight
                pl.BlockSpec((1, CK_pad), lambda i: (0, 0)),      # resident fused bias
            ],
            out_specs=pl.BlockSpec((tm, CK_pad), lambda i: (i, 0)),
            compiler_params=pltpu.CompilerParams(
                dimension_semantics=("parallel",),  # shard batch tiles across TCs (v7x)
            ),
            cost_estimate=cost,
        )(x_flat, w_blk, b_blk)

    # Drop zero pad columns, then a FREE reshape gives (B, K, C) -- already permuted,
    # because the fused weight columns were laid out k-major / c-minor offline.
    return out_flat[:, :CK].reshape(B, K, C)


# ---------------------------------------------------------------------------
# Parameter init + references
# ---------------------------------------------------------------------------
def init_params(key, n_channels, n_features, n_hidden, n_bottleneck):
    """Deterministic init mimicking nn.Linear uniform(-1/sqrt(fan_in), +1/sqrt(fan_in))."""
    k1, k2, k3, k4 = jax.random.split(key, 4)
    lim1 = 1.0 / jnp.sqrt(n_features)
    lim2 = 1.0 / jnp.sqrt(n_hidden)
    w1 = jax.random.uniform(k1, (n_channels, n_features, n_hidden),
                            minval=-lim1, maxval=lim1, dtype=jnp.float32)
    b1 = jax.random.uniform(k2, (n_channels, n_hidden),
                            minval=-lim1, maxval=lim1, dtype=jnp.float32)
    # fc2_shared: nn.Linear(n_hidden, n_bottleneck); weight stored as (H, K) = W.T
    w2 = jax.random.uniform(k3, (n_hidden, n_bottleneck),
                            minval=-lim2, maxval=lim2, dtype=jnp.float32)
    b2 = jax.random.uniform(k4, (n_bottleneck,),
                            minval=-lim2, maxval=lim2, dtype=jnp.float32)
    return w1, b1, w2, b2


def encoder_reference(x, w1, b1, w2, b2):
    """Pure-f32, unfused reference of the PyTorch module."""
    h = jnp.einsum("bcf,cfh->bch", x, w1) + b1[None, :, :]
    e = jnp.einsum("bch,hk->bck", h, w2) + b2[None, None, :]
    return jnp.transpose(e, (0, 2, 1))


def fused_reference(x, w_blk, b_blk, n_channels, n_bottleneck):
    """Pure-JAX version of the SAME fused bf16 computation (kernel exactness check)."""
    B = x.shape[0]
    CK = n_channels * n_bottleneck
    x_flat = x.reshape(B, -1).astype(jnp.bfloat16)
    out = jnp.dot(x_flat, w_blk, preferred_element_type=jnp.float32)
    out = out + b_blk.astype(jnp.float32)
    return out[:, :CK].reshape(B, n_bottleneck, n_channels)


# ---------------------------------------------------------------------------
# Demo / self-test
# ---------------------------------------------------------------------------
if __name__ == "__main__":
    B, C, F, H, K = 8, 7, 32, 32, 16

    key = jax.random.PRNGKey(0)
    kx, kp, kx2 = jax.random.split(key, 3)
    x = jax.random.normal(kx, (B, C, F), dtype=jnp.float32)
    w1, b1, w2, b2 = init_params(kp, C, F, H, K)

    # Offline fusion of the two linear layers into one block-diagonal bf16 weight,
    # with columns pre-permuted to (k, c) order and padded to 128 lanes.
    w_blk, b_blk = prepare_fused_params(w1, b1, w2, b2)

    # --- small-batch path (no grid) ---
    out = encoder_forward(x, w_blk, b_blk, n_channels=C, n_bottleneck=K)
    out = jax.block_until_ready(out)
    assert out.shape == (B, K, C), out.shape

    # vs. the true f32 two-step reference (tolerance reflects bf16 operand rounding;
    # accumulation stays f32 in the kernel)
    ref = encoder_reference(x, w1, b1, w2, b2)
    assert jnp.allclose(out, ref, atol=2e-2, rtol=2e-2), "mismatch vs f32 reference"

    # vs. the identical fused-bf16 computation in pure JAX (kernel exactness)
    fref = fused_reference(x, w_blk, b_blk, C, K)
    assert jnp.allclose(out, fref, atol=1e-4, rtol=1e-4), "mismatch vs fused reference"

    # --- batch-tiled path (grid over B, resident weight, parallel batch axis) ---
    B2 = 2048
    x2 = jax.random.normal(kx2, (B2, C, F), dtype=jnp.float32)
    out2 = encoder_forward(x2, w_blk, b_blk, n_channels=C, n_bottleneck=K, block_b=1024)
    out2 = jax.block_until_ready(out2)
    fref2 = fused_reference(x2, w_blk, b_blk, C, K)
    assert out2.shape == (B2, K, C)
    assert jnp.allclose(out2, fref2, atol=1e-4, rtol=1e-4), "mismatch on tiled path"

    print("KERNEL_OK")
</pallas_src>

<mosaic_0001>
module attributes {stable_mosaic.version = 11 : i64} {
  func.func @encoder_kernel(%arg0: memref<8x224xf32, #tpu.memory_space<vmem>>, %arg1: memref<224x128xbf16, #tpu.memory_space<vmem>>, %arg2: memref<1x128xbf16, #tpu.memory_space<vmem>>, %arg3: memref<8x128xf32, #tpu.memory_space<vmem>>) attributes {dimension_semantics = [], scalar_prefetch = 0 : i64, scratch_operands = 0 : i64, tpu.core_type = #tpu.core_type<tc>} {
    %c0 = arith.constant 0 : index
    %c0_0 = arith.constant 0 : index
    %0 = vector.load %arg0[%c0, %c0_0] : memref<8x224xf32, #tpu.memory_space<vmem>>, vector<8x224xf32>
    %1 = arith.truncf %0 : vector<8x224xf32> to vector<8x224xbf16>
    %c0_1 = arith.constant 0 : index
    %c0_2 = arith.constant 0 : index
    %2 = vector.load %arg1[%c0_1, %c0_2] : memref<224x128xbf16, #tpu.memory_space<vmem>>, vector<224x128xbf16>
    %cst = arith.constant dense<0.000000e+00> : vector<8x128xf32>
    %3 = tpu.matmul %1, %2, %cst {dimension_numbers = #tpu.dot_dimension_numbers<[1], [0], [0], [1], [0, 0, 1, 1], [], []>} : vector<8x224xbf16>, vector<224x128xbf16>, vector<8x128xf32> -> vector<8x128xf32>
    %c0_3 = arith.constant 0 : index
    %c0_4 = arith.constant 0 : index
    %4 = vector.load %arg2[%c0_3, %c0_4] : memref<1x128xbf16, #tpu.memory_space<vmem>>, vector<1x128xbf16>
    %5 = arith.extf %4 : vector<1x128xbf16> to vector<1x128xf32>
    %6 = vector.broadcast %5 : vector<1x128xf32> to vector<8x128xf32>
    %7 = arith.addf %3, %6 : vector<8x128xf32>
    %c0_5 = arith.constant 0 : index
    %c0_6 = arith.constant 0 : index
    %8 = vector.load %arg3[%c0_5, %c0_6] : memref<8x128xf32, #tpu.memory_space<vmem>>, vector<8x128xf32>
    tpu.vector_store %arg3[%c0_5, %c0_6], %7 {strides = array<i32>} : memref<8x128xf32, #tpu.memory_space<vmem>>, vector<8x128xf32>,
    return
  }
}

</mosaic_0001>

<bundles_post_ra>
// kernel: encoder_forward.1
= control target key start
LH: loop header
LB: loop body
LE: loop exit
PB: predicated region body
PF: predicated region fallthrough
CT: control target
= control target key end

     0   :  { %v216_v0 = vmov 0   ;;  %vm137_vm0 = vcmask 785408   ;;  %v49_v19 = vlaneseq  ;;  %s291_s1 = inlined_call_operand.vmem [shape: bf16[224,128], index: 1, kind: input, shape index: {}]   ;;  %s292_s0 = inlined_call_operand.vmem [shape: f32[8,224], index: 0, kind: input, shape index: {}]   ;;  %s293_s2 = inlined_call_operand.vmem [shape: bf16[1,128], index: 2, kind: input, shape index: {}]   ;;  %s294_s3 = inlined_call_operand.vmem [shape: f32[8,128], index: 3, kind: output, shape index: {}]  }
   0x1   :  { %141 = vmatprep.subr.bf16.mxu0 %v216_v0  ;;  %v202_v1 = vld [vmem:[%s291_s1] sm:$0xff]   ;;  %v203_v2 = vld [vmem:[%s291_s1 + $0x8] sm:$0xff]   ;;  %v204_v3 = vld [vmem:[%s291_s1 + $0x10] sm:$0xff]  }
   0x2   :  { %142 = vmatpush1.bf16.msra.mxu0 %v202_v1  ;;  %v205_v4 = vld [vmem:[%s291_s1 + $0x18] sm:$0xff]   ;;  %v206_v5 = vld [vmem:[%s291_s1 + $0x20] sm:$0xff]   ;;  %v16_v6 = vld [vmem:[%s292_s0 + $0x8] sm:$0xff]  ;;  %v50_v20 = vshrl.u32 %v49_v19, 7 }
   0x3   :  { %143 = vmatprep.subr.bf16.mxu0 %v216_v0  ;;  %v18_v7 = vpack.c.bf16 %v16_v6, %v16_v6  ;;  %v207_v8 = vld [vmem:[%s291_s1 + $0x28] sm:$0xff]   ;;  %v208_v9 = vld [vmem:[%s291_s1 + $0x30] sm:$0xff]   ;;  %v209_v10 = vld [vmem:[%s291_s1 + $0x38] sm:$0xff]  }
   0x4   :  { %v210_v11 = vld [vmem:[%s291_s1 + $0x40] sm:$0xff]   ;;  %v211_v12 = vld [vmem:[%s291_s1 + $0x48] sm:$0xff]   ;;  %v212_v13 = vld [vmem:[%s291_s1 + $0x50] sm:$0xff]   ;;  %v51_v23 = vsub.s32 0, %v50_v20 }
   0x5   :  { %200 = vmatprep.mubr.msk.bf16.mxu0 %vm137_vm0, %v18_v7  ;;  %v213_v14 = vld [vmem:[%s291_s1 + $0x58] sm:$0xff]   ;;  %v214_v15 = vld [vmem:[%s291_s1 + $0x60] sm:$0xff]   ;;  %v215_v16 = vld [vmem:[%s291_s1 + $0x68] sm:$0xff]  }
   0x6   :  { %144 = vmatpush1.bf16.msra.mxu0 %v203_v2  ;;  %v15_v17 = vld [vmem:[%s292_s0] sm:$0xff] }
   0x7   :  { %145 = vmatprep.subr.bf16.mxu0 %v216_v0  ;;  %v17_v18 = vpack.c.bf16 %v15_v17, %v15_v17  ;;  %v47_v21 = vld [vmem:[%s293_s2] sm:$0x1] }
   0x8   :  { %v48_v22 = vunpack.c.l.bf16 %v47_v21 }
   0xa   :  { %146 = vmatpush1.bf16.msra.mxu0 %v204_v3  ;;  %v52_v24 = vrot.slane %v48_v22, %v51_v23 }
   0xb   :  { %147 = vmatprep.subr.bf16.mxu0 %v216_v0 }
   0xe   :  { %148 = vmatpush1.bf16.msra.mxu0 %v205_v4 }
   0xf   :  { %149 = vmatprep.subr.bf16.mxu0 %v216_v0 }
  0x12   :  { %150 = vmatpush1.bf16.msra.mxu0 %v206_v5 }
  0x13   :  { %151 = vmatprep.subr.bf16.mxu0 %v216_v0 }
  0x16   :  { %152 = vmatpush1.bf16.msra.mxu0 %v207_v8 }
  0x17   :  { %153 = vmatprep.subr.bf16.mxu0 %v216_v0 }
  0x1a   :  { %154 = vmatpush1.bf16.msra.mxu0 %v208_v9 }
  0x1b   :  { %155 = vmatprep.subr.bf16.mxu0 %v216_v0 }
  0x1e   :  { %156 = vmatpush1.bf16.msra.mxu0 %v209_v10 }
  0x1f   :  { %157 = vmatprep.subr.bf16.mxu0 %v216_v0 }
  0x22   :  { %158 = vmatpush1.bf16.msra.mxu0 %v210_v11 }
  0x23   :  { %159 = vmatprep.subr.bf16.mxu0 %v216_v0 }
  0x26   :  { %160 = vmatpush1.bf16.msra.mxu0 %v211_v12 }
  0x27   :  { %161 = vmatprep.subr.bf16.mxu0 %v216_v0 }
  0x2a   :  { %162 = vmatpush1.bf16.msra.mxu0 %v212_v13 }
  0x2b   :  { %163 = vmatprep.subr.bf16.mxu0 %v216_v0 }
  0x2e   :  { %164 = vmatpush1.bf16.msra.mxu0 %v213_v14 }
  0x2f   :  { %165 = vmatprep.subr.bf16.mxu0 %v216_v0 }
  0x32   :  { %166 = vmatpush1.bf16.msra.mxu0 %v214_v15 }
  0x33   :  { %167 = vmatprep.subr.bf16.mxu0 %v216_v0 }
  0x36   :  { %168 = vmatpush1.bf16.msra.mxu0 %v215_v16 }
  0x39   :  { %174 = vmatmul.mubr.bf16.vlgmr.msra.gmra.mrb[0].mxu0 %v17_v18 }
 0x10c   :  { %v175_v25 = vpop.f32.mrb[0].mxu0 }
 0x10d   :  { %v176_v26 = vadd.f32 %v175_v25, %v52_v24  ;;  %v177_v27 = vpop.f32.mrb[1].mxu0 }
 0x10e   :  { %v178_v28 = vpop.f32.mrb[2].mxu0 }
 0x10f   :  { %181 = vst [vmem:[%s294_s3] sm:$0xff] %v176_v26  ;;  %v179_v29 = vpop.f32.mrb[3].mxu0 }

</bundles_post_ra>
